<compile_context>
chip_gen: v7x
topology: tpu7x:2x2x1
jax: 0.10.0
libtpu: 0.0.40
codegen_flags: <defaults>
</compile_context>

<pallas_src>
import functools

import jax
import jax.numpy as jnp
from jax.experimental import pallas as pl
from jax.experimental.pallas import tpu as pltpu

_LANE = 128
_SUBLANE = 8


def _mse_partial_kernel(org_ref, shf_ref, out_ref, acc_ref, *,
                        block_rows, blocks_per_split, total_blocks,
                        valid_rows, has_tail, has_dup):
    i = pl.program_id(0)   # split axis ("parallel": maps to TensorCores on v7x)
    j = pl.program_id(1)   # streaming reduction axis ("arbitrary")

    @pl.when(j == 0)
    def _init():
        acc_ref[...] = jnp.zeros_like(acc_ref)

    blk = i * blocks_per_split + j   # nominal global block index

    def _accumulate(masked):
        d = org_ref[...].astype(jnp.float32) - shf_ref[...].astype(jnp.float32)
        sq = d * d
        if masked:
            # Only the (single) genuinely-partial tail block takes this path.
            row = blk * block_rows + jax.lax.broadcasted_iota(
                jnp.int32, sq.shape, 0)
            sq = jnp.where(row < valid_rows, sq, 0.0)
        # Fold the whole block into the tiny (8, 128) accumulator: same VALU
        # add count as a full-block RMW, but ~4 KiB of accumulator traffic per
        # step instead of megabytes (no extra vld/vst streams in the hot loop).
        acc_ref[...] += sq.reshape(
            block_rows // _SUBLANE, _SUBLANE, _LANE).sum(axis=0)

    if not (has_tail or has_dup):
        # Common path: every block is full and real -> no iota, no mask,
        # no predicates.
        _accumulate(masked=False)
    else:
        interior = None
        if has_dup:
            interior = blk < total_blocks            # skip duplicated blocks
        if has_tail:
            not_tail = blk != (total_blocks - 1)
            interior = not_tail if interior is None else (interior & not_tail)

        @pl.when(interior)
        def _interior():
            _accumulate(masked=False)

        if has_tail:
            @pl.when(blk == total_blocks - 1)
            def _tail():
                _accumulate(masked=True)

    @pl.when(j == pl.num_programs(1) - 1)
    def _fini():
        out_ref[...] = acc_ref[...][None]


def _num_tensorcores():
    """Best-effort TensorCores-per-device count (2 only on v7x-class chips)."""
    try:
        kind = str(getattr(jax.devices()[0], "device_kind", "")).lower()
        if "v7" in kind:
            return 2
    except Exception:
        pass
    return 1


def content_loss(org, shifted, *, block_rows=4096, num_splits=None):
    """MSE loss between org (detached) and shifted; returns a float32 scalar."""
    assert org.shape == shifted.shape, "org / shifted shape mismatch"

    # .detach() equivalent (forward-only module; the loss value is identical).
    org = jax.lax.stop_gradient(org)

    n = org.size
    in_bytes = n * (org.dtype.itemsize + shifted.dtype.itemsize)

    flat_o = org.reshape(-1)
    flat_s = shifted.reshape(-1)

    # Only pad to a lane multiple when strictly necessary (feature maps are
    # normally already a multiple of 128, so the common path is copy-free).
    # Pad values are 0 in both inputs -> they contribute exactly 0 to the sum.
    lane_pad = (-n) % _LANE
    if lane_pad:
        flat_o = jnp.pad(flat_o, (0, lane_pad))
        flat_s = jnp.pad(flat_s, (0, lane_pad))

    rows = (n + lane_pad) // _LANE
    o2 = flat_o.reshape(rows, _LANE)
    s2 = flat_s.reshape(rows, _LANE)

    # Row-block granularity: 8 sublanes for pure f32; 16 when any input is a
    # sub-32-bit dtype (bf16 packs two rows per sublane -> (16,128) native tile).
    min_rows = _SUBLANE
    if org.dtype.itemsize < 4 or shifted.dtype.itemsize < 4:
        min_rows = 2 * _SUBLANE

    block_rows = max(min_rows, (int(block_rows) // min_rows) * min_rows)
    block_rows = min(block_rows, pl.cdiv(rows, min_rows) * min_rows)

    total_blocks = pl.cdiv(rows, block_rows)

    if num_splits is None:
        num_splits = _num_tensorcores()
    n_split = num_splits if total_blocks >= num_splits else 1
    bps = pl.cdiv(total_blocks, n_split)

    has_tail = (rows % block_rows) != 0          # one partial last block
    has_dup = (bps * n_split) != total_blocks    # clamped overflow block(s)

    if has_dup:
        def in_map(i, j):
            # Clamp so no DMA originates past the end of the array; duplicated
            # blocks are skipped inside the kernel.
            return (jnp.minimum(i * bps + j, total_blocks - 1), 0)
    else:
        def in_map(i, j):
            return (i * bps + j, 0)

    kernel = functools.partial(
        _mse_partial_kernel,
        block_rows=block_rows,
        blocks_per_split=bps,
        total_blocks=total_blocks,
        valid_rows=rows,
        has_tail=has_tail,
        has_dup=has_dup,
    )

    cost = pl.CostEstimate(
        flops=3 * n,               # sub, mul, add per element
        transcendentals=0,
        bytes_accessed=in_bytes + n_split * _SUBLANE * _LANE * 4,
    )

    # VMEM budget: 2 inputs x 2 pipeline buffers of (block_rows, 128) in their
    # native dtype plus the (8,128) f32 accumulator; ask for 2x headroom,
    # floored at 16 MiB (v5e scoped default) and capped well under every
    # generation's physical per-TC VMEM (v7x: 64 MiB).
    vmem_need = (2 * block_rows * _LANE *
                 (org.dtype.itemsize + shifted.dtype.itemsize)
                 + _SUBLANE * _LANE * 4)
    vmem_limit = int(min(max(2 * vmem_need, 16 << 20), 48 << 20))

    partials = pl.pallas_call(
        kernel,
        out_shape=jax.ShapeDtypeStruct((n_split, _SUBLANE, _LANE), jnp.float32),
        grid_spec=pltpu.PrefetchScalarGridSpec(
            num_scalar_prefetch=0,
            grid=(n_split, bps),
            in_specs=[
                pl.BlockSpec((block_rows, _LANE), in_map),
                pl.BlockSpec((block_rows, _LANE), in_map),
            ],
            out_specs=pl.BlockSpec((1, _SUBLANE, _LANE), lambda i, j: (i, 0, 0)),
            scratch_shapes=[pltpu.VMEM((_SUBLANE, _LANE), jnp.float32)],
        ),
        compiler_params=pltpu.CompilerParams(
            dimension_semantics=("parallel", "arbitrary"),
            vmem_limit_bytes=vmem_limit,
        ),
        cost_estimate=cost,
    )(o2, s2)

    # Tiny final cross-lane reduce + divide by N in the wrapper.
    return jnp.sum(partials) / jnp.float32(n)


if __name__ == "__main__":
    key = jax.random.PRNGKey(0)
    k1, k2, k3, k4, k5, k6 = jax.random.split(key, 6)

    # Small NCHW feature maps, matching the module's forward(org, shifted).
    shape = (2, 4, 16, 16)
    org = jax.random.normal(k1, shape, dtype=jnp.float32)
    shifted = jax.random.normal(k2, shape, dtype=jnp.float32)

    loss = content_loss(org, shifted)
    jax.block_until_ready(loss)
    ref = jnp.mean((org - shifted) ** 2)
    assert jnp.allclose(loss, ref, rtol=1e-5, atol=1e-6), (loss, ref)

    # Larger shape with an explicit 2-way split: exercises multi-block
    # streaming, the clamped duplicate block (skipped in-kernel) and the
    # masked partial tail block.
    shape2 = (2, 16, 96, 96)
    org2 = jax.random.normal(k3, shape2, dtype=jnp.float32)
    shifted2 = jax.random.normal(k4, shape2, dtype=jnp.float32)
    loss2 = content_loss(org2, shifted2, block_rows=1024, num_splits=2)
    jax.block_until_ready(loss2)
    ref2 = jnp.mean((org2 - shifted2) ** 2)
    assert jnp.allclose(loss2, ref2, rtol=1e-5, atol=1e-6), (loss2, ref2)

    # Non-multiple-of-128 element count: exercises lane padding + tail mask.
    shape3 = (3, 5, 7, 11)
    org3 = jax.random.normal(k5, shape3, dtype=jnp.float32)
    shifted3 = jax.random.normal(k6, shape3, dtype=jnp.float32)
    loss3 = content_loss(org3, shifted3)
    jax.block_until_ready(loss3)
    ref3 = jnp.mean((org3 - shifted3) ** 2)
    assert jnp.allclose(loss3, ref3, rtol=1e-5, atol=1e-6), (loss3, ref3)

    # bf16 inputs stream as bf16 (half the HBM bytes) and are cast in-kernel;
    # block_rows is rounded to the (16,128) bf16-native tile.
    org_bf = org.astype(jnp.bfloat16)
    shf_bf = shifted.astype(jnp.bfloat16)
    loss_bf = content_loss(org_bf, shf_bf)
    jax.block_until_ready(loss_bf)
    ref_bf = jnp.mean(
        (org_bf.astype(jnp.float32) - shf_bf.astype(jnp.float32)) ** 2)
    assert jnp.allclose(loss_bf, ref_bf, rtol=1e-4, atol=1e-5), (loss_bf, ref_bf)

    print("KERNEL_OK")
</pallas_src>

<mosaic_0001>
module attributes {stable_mosaic.version = 11 : i64} {
  func.func @_mse_partial_kernel(%arg0: i32, %arg1: i32, %arg2: memref<16x128xf32, #tpu.memory_space<vmem>>, %arg3: memref<16x128xf32, #tpu.memory_space<vmem>>, %arg4: memref<1x8x128xf32, #tpu.memory_space<vmem>>, %arg5: memref<8x128xf32, #tpu.memory_space<vmem>>) attributes {dimension_semantics = [#tpu.dimension_semantics<parallel>, #tpu.dimension_semantics<arbitrary>], iteration_bounds = array<i64: 1, 1>, scalar_prefetch = 0 : i64, scratch_operands = 1 : i64, tpu.core_type = #tpu.core_type<tc>, window_params = [{transform_indices = @transform_0, window_bounds = array<i64: 16, 128>}, {transform_indices = @transform_1, window_bounds = array<i64: 16, 128>}, {transform_indices = @transform_2, window_bounds = array<i64: 1, 8, 128>}]} {
    %c0_i32 = arith.constant 0 : i32
    %0 = arith.cmpi eq, %arg1, %c0_i32 : i32
    %1 = arith.extui %0 : i1 to i32
    %c0_i32_0 = arith.constant 0 : i32
    %2 = arith.cmpi ne, %1, %c0_i32_0 : i32
    scf.if %2 {
      %cst_10 = arith.constant 0.000000e+00 : f32
      %15 = vector.broadcast %cst_10 : f32 to vector<8x128xf32>
      %c0_11 = arith.constant 0 : index
      %c0_12 = arith.constant 0 : index
      %16 = vector.load %arg5[%c0_11, %c0_12] : memref<8x128xf32, #tpu.memory_space<vmem>>, vector<8x128xf32>
      tpu.vector_store %arg5[%c0_11, %c0_12], %15 {strides = array<i32>} : memref<8x128xf32, #tpu.memory_space<vmem>>, vector<8x128xf32>,
    } else {
    }
    %c0 = arith.constant 0 : index
    %c0_1 = arith.constant 0 : index
    %3 = vector.load %arg2[%c0, %c0_1] : memref<16x128xf32, #tpu.memory_space<vmem>>, vector<16x128xf32>
    %c0_2 = arith.constant 0 : index
    %c0_3 = arith.constant 0 : index
    %4 = vector.load %arg3[%c0_2, %c0_3] : memref<16x128xf32, #tpu.memory_space<vmem>>, vector<16x128xf32>
    %5 = arith.subf %3, %4 : vector<16x128xf32>
    %6 = arith.mulf %5, %5 : vector<16x128xf32>
    %c0_4 = arith.constant 0 : index
    %c0_5 = arith.constant 0 : index
    %7 = vector.load %arg5[%c0_4, %c0_5] : memref<8x128xf32, #tpu.memory_space<vmem>>, vector<8x128xf32>
    %8 = vector.shape_cast %6 : vector<16x128xf32> to vector<2x8x128xf32>
    %cst = arith.constant dense<0.000000e+00> : vector<8x128xf32>
    %9 = vector.multi_reduction <add>, %8, %cst [0] : vector<2x8x128xf32> to vector<8x128xf32>
    %10 = arith.addf %7, %9 : vector<8x128xf32>
    %c0_6 = arith.constant 0 : index
    %c0_7 = arith.constant 0 : index
    %11 = vector.load %arg5[%c0_6, %c0_7] : memref<8x128xf32, #tpu.memory_space<vmem>>, vector<8x128xf32>
    tpu.vector_store %arg5[%c0_6, %c0_7], %10 {strides = array<i32>} : memref<8x128xf32, #tpu.memory_space<vmem>>, vector<8x128xf32>,
    %c0_i32_8 = arith.constant 0 : i32
    %12 = arith.cmpi eq, %arg1, %c0_i32_8 : i32
    %13 = arith.extui %12 : i1 to i32
    %c0_i32_9 = arith.constant 0 : i32
    %14 = arith.cmpi ne, %13, %c0_i32_9 : i32
    scf.if %14 {
      %c0_10 = arith.constant 0 : index
      %c0_11 = arith.constant 0 : index
      %15 = vector.load %arg5[%c0_10, %c0_11] : memref<8x128xf32, #tpu.memory_space<vmem>>, vector<8x128xf32>
      %16 = vector.shape_cast %15 : vector<8x128xf32> to vector<1x8x128xf32>
      %c0_12 = arith.constant 0 : index
      %c0_13 = arith.constant 0 : index
      %c0_14 = arith.constant 0 : index
      %17 = vector.load %arg4[%c0_12, %c0_13, %c0_14] : memref<1x8x128xf32, #tpu.memory_space<vmem>>, vector<1x8x128xf32>
      tpu.vector_store %arg4[%c0_12, %c0_13, %c0_14], %16 {strides = array<i32>} : memref<1x8x128xf32, #tpu.memory_space<vmem>>, vector<1x8x128xf32>,
    } else {
    }
    return
  }
  func.func @transform_0(%arg0: i32, %arg1: i32) -> (i32, i32) {
    %c1_i32 = arith.constant 1 : i32
    %0 = arith.muli %arg0, %c1_i32 : i32
    %1 = arith.addi %0, %arg1 : i32
    %c0_i32 = arith.constant 0 : i32
    %c0_i32_0 = arith.constant 0 : i32
    return %1, %c0_i32 : i32, i32
  }
  func.func @transform_1(%arg0: i32, %arg1: i32) -> (i32, i32) {
    %c1_i32 = arith.constant 1 : i32
    %0 = arith.muli %arg0, %c1_i32 : i32
    %1 = arith.addi %0, %arg1 : i32
    %c0_i32 = arith.constant 0 : i32
    %c0_i32_0 = arith.constant 0 : i32
    return %1, %c0_i32 : i32, i32
  }
  func.func @transform_2(%arg0: i32, %arg1: i32) -> (i32, i32, i32) {
    %c0_i32 = arith.constant 0 : i32
    %c0_i32_0 = arith.constant 0 : i32
    %c0_i32_1 = arith.constant 0 : i32
    return %arg0, %c0_i32, %c0_i32_0 : i32, i32, i32
  }
}

</mosaic_0001>

<bundles_post_ra>
// kernel: tpu_custom_call.1
= control target key start
LH: loop header
LB: loop body
LE: loop exit
PB: predicated region body
PF: predicated region fallthrough
CT: control target
= control target key end

     0   :  { %7 = vsyncpa [#allocation4], 0  ;;  %s223_s0 = inlined_call_operand.hbm [shape: f32[16,128], index: 0, kind: input, shape index: {}]   ;;  %s224_s1 = inlined_call_operand.hbm [shape: f32[16,128], index: 1, kind: input, shape index: {}]   ;;  %s225_s2 = inlined_call_operand.hbm [shape: f32[1,8,128], index: 2, kind: output, shape index: {}]  }
   0x1   :  { %8 = vsyncpa [#allocation7], 0 }
   0x2   :  { %9 = vsyncpa [#allocation5], 0  ;;  %s167_s9 = smov [#allocation3]   ;;  %s95_s13 = scalar_lea.hbm %s223_s0, 256 }
   0x3   :  { %s19_s10 = sshll.u32 %s167_s9, 4  ;;  %p96_p0 = scmp.ne.s32.totalorder %s223_s0, %s95_s13  ;;  %s20_s10 = int_to_ptr.vmem [resolvable:$true] %s19_s10 }
   0x4   :  { %p99_p1 = scmp.lt.u32.totalorder %s95_s13, %s223_s0 }
   0x6   :  { %p101_p2 = pnand %p99_p1, %p96_p0 }
   0x8   :  { %104 = shalt.err (!%p101_p2)
}
   0x9   :  { %s105_s18 = scalar_lea.vmem %s20_s10, 256  ;;  %p110_p4 = scmp.lt.s32.totalorder %s20_s10, %s20_s10 }
   0xa   :  { %p106_p3 = scmp.ne.s32.totalorder %s20_s10, %s105_s18  ;;  %p111_p5 = scmp.lt.s32.totalorder %s105_s18, %s105_s18 }
   0xc   :  { %p112_p6 = por %p111_p5, %p110_p4 }
   0xe   :  { %p113_p7 = pnand %p112_p6, %p106_p3 }
  0x10   :  { %116 = shalt.err (!%p113_p7)
}
  0x11   :  { %s168_s19 = smov 128   ;;  %s169_s20 = smov 8  }
  0x12   :  { %25 = dma.hbm_to_vmem [thread:$0]  %s223_s0, 256, %s20_s10, [#allocation4], %s168_s19, %s168_s19, %s169_s20  }
  0x13   :  { %s170_s23 = smov [#allocation6]   ;;  %s117_s27 = scalar_lea.hbm %s224_s1, 256 }
  0x14   :  { %s35_s24 = sshll.u32 %s170_s23, 4  ;;  %p118_p8 = scmp.ne.s32.totalorder %s224_s1, %s117_s27  ;;  %s36_s24 = int_to_ptr.vmem [resolvable:$true] %s35_s24 }
  0x15   :  { %p121_p9 = scmp.lt.u32.totalorder %s117_s27, %s224_s1 }
  0x17   :  { %p123_p10 = pnand %p121_p9, %p118_p8 }
  0x19   :  { %126 = shalt.err (!%p123_p10)
}
  0x1a   :  { %s127_s4 = scalar_lea.vmem %s36_s24, 256  ;;  %p132_p12 = scmp.lt.s32.totalorder %s36_s24, %s36_s24 }
  0x1b   :  { %p128_p11 = scmp.ne.s32.totalorder %s36_s24, %s127_s4  ;;  %p133_p13 = scmp.lt.s32.totalorder %s127_s4, %s127_s4 }
  0x1d   :  { %p134_p0 = por %p133_p13, %p132_p12 }
  0x1f   :  { %p135_p1 = pnand %p134_p0, %p128_p11 }
  0x21   :  { %138 = shalt.err (!%p135_p1)
}
  0x22   :  { %41 = dma.hbm_to_vmem [thread:$0]  %s224_s1, 256, %s36_s24, [#allocation7], %s168_s19, %s168_s19, %s169_s20  }
  0x23   :  { %161 = dma.done.wait [#allocation4], 256  }
  0x24   :  { %162 = vsyncadd [#allocation4], 4294967040 }
  0x25   :  { %163 = dma.done.wait [#allocation7], 256  }
  0x26   :  { %164 = vsyncadd [#allocation7], 4294967040  ;;  %v57_v0 = vld [vmem:[#allocation3] sm:$0xff]  ;;  %v58_v1 = vld [vmem:[#allocation3 + $0x8] sm:$0xff]  ;;  %s171_s6 = smov [#allocation8]  }
  0x27   :  { %v59_v2 = vld [vmem:[#allocation6] sm:$0xff]  ;;  %v60_v3 = vld [vmem:[#allocation6 + $0x8] sm:$0xff]  ;;  %s80_s7 = sshll.u32 %s171_s6, 4  ;;  %s81_s7 = int_to_ptr.vmem [resolvable:$true] %s80_s7 }
  0x28   :  { %v61_v4 = vsub.f32 %v57_v0, %v59_v2  ;;  %v62_v5 = vsub.f32 %v58_v1, %v60_v3  ;;  %s139_s8 = scalar_lea.vmem %s81_s7, 128  ;;  %p144_p3 = scmp.lt.s32.totalorder %s81_s7, %s81_s7 }
  0x29   :  { %p140_p2 = scmp.ne.s32.totalorder %s81_s7, %s139_s8  ;;  %p145_p4 = scmp.lt.s32.totalorder %s139_s8, %s139_s8 }
  0x2a   :  { %v63_v6 = vmul.f32 %v61_v4, %v61_v4  ;;  %v64_v7 = vmul.f32 %v62_v5, %v62_v5 }
  0x2b   :  { %p146_p5 = por %p145_p4, %p144_p3 }
  0x2c   :  { %v66_v8 = vadd.f32 %v64_v7, %v63_v6 }
  0x2d   :  { %p147_p6 = pnand %p146_p5, %p140_p2 }
  0x2e   :  { %73 = vst [vmem:[#allocation8] sm:$0xff] %v66_v8 }
  0x2f   :  { %150 = shalt.err (!%p147_p6)
}
  0x30   :  { %s151_s10 = scalar_lea.hbm %s225_s2, 128 }
  0x31   :  { %p152_p7 = scmp.ne.s32.totalorder %s225_s2, %s151_s10  ;;  %p155_p8 = scmp.lt.u32.totalorder %s151_s10, %s225_s2 }
  0x33   :  { %p157_p9 = pnand %p155_p8, %p152_p7 }
  0x35   :  { %160 = shalt.err (!%p157_p9)
}
  0x36   :  { %83 = dma.vmem_to_hbm [thread:$0]  %s81_s7, 128, %s225_s2, [#allocation5]  }
  0x37   :  { %165 = dma.done.wait [#allocation5], 128  }
  0x38   :  { %166 = vsyncadd [#allocation5], 4294967168 }
  0x39   :  { %87 = vsyncpa [#allocation4], 1 }
  0x3a   :  { %88 = vsyncpa [#allocation7], 1 }
  0x3b   :  { %89 = vsyncpa [#allocation5], 1 }

</bundles_post_ra>
